<compile_context>
chip_gen: v5e
topology: v5e:2x2
jax: 0.10.0
libtpu: 0.0.40
codegen_flags: <defaults>
</compile_context>

<pallas_src>
import math
import functools

import jax
import jax.numpy as jnp
from jax import lax
from jax.experimental import pallas as pl
from jax.experimental.pallas import tpu as pltpu


# ----------------------------- tiling helper --------------------------------

def _pick_tile(dim, target, multiple):
    """Largest tile <= target that divides `dim` and is a multiple of
    `multiple` (keeps the BlockSpec (8,128) rule and bounds the per-block VMEM
    footprint by the target -- matters on v7x's 64 MiB VMEM).  Uses the full
    dim only when it is already <= target (small/test shapes) or for
    pathological sizes with no suitable divisor."""
    if dim <= target:
        return dim
    t = (target // multiple) * multiple
    while t >= multiple:
        if dim % t == 0:
            return t
        t -= multiple
    return dim  # pathological (e.g. large prime) -- accept the full dim


# ------------------------- tiled linear projection ---------------------------

def _matmul_kernel(x_ref, w_ref, o_ref, acc_ref):
    """One (tm, tn) output tile; K is the innermost ("arbitrary") grid axis."""
    @pl.when(pl.program_id(2) == 0)
    def _():
        acc_ref[...] = jnp.zeros_like(acc_ref)

    # Weight is pre-transposed to (K, N) once at parameter-load time, so the
    # MXU contraction is a plain x @ w with no per-tile transposes.
    acc_ref[...] += jnp.dot(x_ref[...], w_ref[...],
                            preferred_element_type=jnp.float32)

    @pl.when(pl.program_id(2) == pl.num_programs(2) - 1)
    def _():
        o_ref[...] = acc_ref[...].astype(o_ref.dtype)


def linear_pallas(x2d, w_t, *, tm=512, tn=512, tk=1024):
    """x2d: (M, K); w_t: (K, N) pre-transposed nn.Linear weight. Returns x2d @ w_t."""
    M, K = x2d.shape
    K2, N = w_t.shape
    assert K == K2
    tm = _pick_tile(M, tm, 8)     # sublane dim of x / out blocks
    tn = _pick_tile(N, tn, 128)   # lane dim of w / out blocks
    tk = _pick_tile(K, tk, 128)   # lane dim of x block, sublane dim of w block
    grid = (M // tm, N // tn, K // tk)
    return pl.pallas_call(
        _matmul_kernel,
        out_shape=jax.ShapeDtypeStruct((M, N), x2d.dtype),
        grid_spec=pltpu.PrefetchScalarGridSpec(
            num_scalar_prefetch=0,
            grid=grid,
            in_specs=[
                pl.BlockSpec((tm, tk), lambda i, j, k: (i, k)),
                pl.BlockSpec((tk, tn), lambda i, j, k: (k, j)),
            ],
            out_specs=pl.BlockSpec((tm, tn), lambda i, j, k: (i, j)),
            scratch_shapes=[pltpu.VMEM((tm, tn), jnp.float32)],
        ),
        compiler_params=pltpu.CompilerParams(
            dimension_semantics=("parallel", "parallel", "arbitrary")),
    )(x2d, w_t)


# ------------------------ flash attention (causal, GQA) ----------------------

def _flash_attn_kernel(q_ref, k_ref, v_ref, o_ref, m_ref, l_ref, acc_ref,
                       *, scale, tq, tk, n_rep, head_dim):
    qi = pl.program_id(2)
    ki = pl.program_id(3)
    R = n_rep * tq                      # query rows served per K/V residency

    @pl.when(ki == 0)
    def _():
        m_ref[...] = jnp.full_like(m_ref, -1e30)
        l_ref[...] = jnp.zeros_like(l_ref)
        acc_ref[...] = jnp.zeros_like(acc_ref)

    q_first = qi * tq                   # first query row of this Q tile
    q_last = qi * tq + (tq - 1)         # last query row of this Q tile
    kv_first = ki * tk                  # first key column of this KV tile
    kv_last = ki * tk + (tk - 1)        # last key column of this KV tile

    def qk_scores():
        # Scale the (R, Hd) Q tile instead of the (R, tk) scores: fewer VPU muls.
        q = q_ref[0, 0].reshape(R, head_dim) * scale
        k = k_ref[0, 0]
        return lax.dot_general(          # q @ k.T -> (R, tk), f32 accumulation
            q, k, dimension_numbers=(((1,), (1,)), ((), ())),
            preferred_element_type=jnp.float32)

    def online_update(s, keep=None):
        v = v_ref[0, 0]
        m_prev = m_ref[...]
        m_new = jnp.maximum(m_prev, jnp.max(s, axis=-1, keepdims=True))
        alpha = jnp.exp(m_prev - m_new)
        p = jnp.exp(s - m_new)                       # f32 softmax math
        if keep is not None:
            # Zero masked probabilities so fully-masked rows (possible when
            # tq != tk) contribute nothing even while m is at its init value.
            p = jnp.where(keep, p, 0.0)
        l_ref[...] = alpha * l_ref[...] + jnp.sum(p, axis=-1, keepdims=True)
        acc_ref[...] = alpha * acc_ref[...] + jnp.dot(
            p.astype(v.dtype), v, preferred_element_type=jnp.float32)
        m_ref[...] = m_new

    # Interior tiles: entirely below the causal diagonal -> no mask math at all.
    @pl.when(kv_last <= q_first)
    def _():
        online_update(qk_scores())

    # Diagonal tiles: straddle the causal boundary -> iota/compare/select mask.
    @pl.when((kv_first <= q_last) & (kv_last > q_first))
    def _():
        s = qk_scores()
        rows = q_first + lax.broadcasted_iota(
            jnp.int32, (n_rep, tq, tk), 1).reshape(R, tk)
        cols = kv_first + lax.broadcasted_iota(jnp.int32, (R, tk), 1)
        keep = cols <= rows
        online_update(jnp.where(keep, s, -1e30), keep=keep)

    # Tiles fully above the diagonal run neither branch; their K/V DMA is also
    # skipped by the clamped index_map in flash_attention_pallas.

    @pl.when(ki == pl.num_programs(3) - 1)
    def _():
        # Exact reciprocal: one per output row per full KV sweep (negligible);
        # keeps the tight f32 test tolerance.
        inv_l = pl.reciprocal(l_ref[...], approx=False)
        o_ref[0, 0] = (acc_ref[...] * inv_l).astype(
            o_ref.dtype).reshape(n_rep, tq, head_dim)


def flash_attention_pallas(q, k, v, *, tq=256, tk=256):
    """q: (B, Hkv, n_rep, S, Hd); k, v: (B, Hkv, S, Hd).
    Causal flash attention with GQA: one K/V tile DMA serves all n_rep query
    heads of its KV head, and causally-masked KV tiles are neither computed
    (pl.when guards) nor fetched (clamped K/V block index)."""
    B, Hkv, n_rep, S, Hd = q.shape
    tq = _pick_tile(S, tq, 8)
    tk = _pick_tile(S, tk, 8)
    scale = 1.0 / math.sqrt(Hd)
    grid = (B, Hkv, S // tq, S // tk)
    kernel = functools.partial(_flash_attn_kernel, scale=scale, tq=tq, tk=tk,
                               n_rep=n_rep, head_dim=Hd)

    def q_map(b, h, qi, ki):
        return (b, h, 0, qi, 0)

    def kv_map(b, h, qi, ki):
        # Clamp past the causal diagonal: the block index stops changing, so
        # Pallas issues no new DMA for tiles the compute guard skips anyway.
        last_needed = (qi * tq + tq - 1) // tk
        return (b, h, jnp.minimum(ki, last_needed), 0)

    q_spec = pl.BlockSpec((1, 1, n_rep, tq, Hd), q_map)
    kv_spec = pl.BlockSpec((1, 1, tk, Hd), kv_map)
    o_spec = pl.BlockSpec((1, 1, n_rep, tq, Hd), q_map)

    return pl.pallas_call(
        kernel,
        out_shape=jax.ShapeDtypeStruct((B, Hkv, n_rep, S, Hd), q.dtype),
        grid_spec=pltpu.PrefetchScalarGridSpec(
            num_scalar_prefetch=0,
            grid=grid,
            in_specs=[q_spec, kv_spec, kv_spec],
            out_specs=o_spec,
            scratch_shapes=[
                pltpu.VMEM((n_rep * tq, 1), jnp.float32),    # running max m
                pltpu.VMEM((n_rep * tq, 1), jnp.float32),    # running denom l
                pltpu.VMEM((n_rep * tq, Hd), jnp.float32),   # output accumulator
            ],
        ),
        compiler_params=pltpu.CompilerParams(
            dimension_semantics=("parallel", "parallel", "parallel", "arbitrary")),
    )(q, k, v)


# ------------------------------- JAX glue ------------------------------------

def precompute_pos_cis(head_dim, seq_len, theta=10000.0):
    """(cos, sin) each (seq_len, head_dim // 2), matching torch.polar(ones, outer(t, freqs))."""
    freqs = 1.0 / (theta ** (jnp.arange(0, head_dim, 2, dtype=jnp.float32) / head_dim))
    t = jnp.arange(seq_len, dtype=jnp.float32)
    angles = jnp.outer(t, freqs)
    return jnp.cos(angles), jnp.sin(angles)


def apply_rotary_emb(xq, xk, cos, sin):
    """xq: (B,S,H,Hd), xk: (B,S,Hkv,Hd); cos/sin: (S, Hd//2).
    Interleaved (even, odd) pairs as complex numbers (view_as_complex semantics)."""
    def rot(x):
        xs = x.astype(jnp.float32).reshape(*x.shape[:-1], -1, 2)
        xe, xo = xs[..., 0], xs[..., 1]
        c = cos[None, :, None, :]
        s = sin[None, :, None, :]
        re = xe * c - xo * s
        im = xe * s + xo * c
        return jnp.stack([re, im], axis=-1).reshape(x.shape).astype(x.dtype)
    return rot(xq), rot(xk)


def prepare_attention_params(params):
    """One-time, parameter-load-time work hoisted out of the forward pass:
    fuse wq/wk/wv into one weight and pre-transpose to (in, out) so the matmul
    kernel contracts the RHS on its leading (sublane) dim without per-tile
    transposes or per-call HBM copies."""
    wqkv = jnp.concatenate([params["wq"], params["wk"], params["wv"]], axis=0)
    return {"wqkv_t": wqkv.T, "wo_t": params["wo"].T}


def attention_forward(prepared, x, cos, sin, n_heads, n_kv_heads,
                      attn_tq=256, attn_tk=256):
    B, S, D = x.shape
    head_dim = D // n_heads
    n_rep = n_heads // n_kv_heads
    q_out = n_heads * head_dim
    kv_out = n_kv_heads * head_dim

    # Fused QKV projection: one kernel launch, x read from HBM once.
    x2d = x.reshape(B * S, D)
    qkv = linear_pallas(x2d, prepared["wqkv_t"])            # (B*S, q_out + 2*kv_out)
    xq = qkv[:, :q_out].reshape(B, S, n_heads, head_dim)
    xk = qkv[:, q_out:q_out + kv_out].reshape(B, S, n_kv_heads, head_dim)
    xv = qkv[:, q_out + kv_out:].reshape(B, S, n_kv_heads, head_dim)

    xq, xk = apply_rotary_emb(xq, xk, cos, sin)
    # TODO(synk): fuse the rotary rotation into the attention kernel (cos/sin
    # tiles indexed by qi/ki) to remove this extra HBM round trip of Q/K.

    # Group the n_rep query heads that share each KV head:
    #   Q -> (B, Hkv, n_rep, S, Hd); K/V -> (B, Hkv, S, Hd), never repeated.
    q5 = xq.transpose(0, 2, 1, 3).reshape(B, n_kv_heads, n_rep, S, head_dim)
    k4 = xk.transpose(0, 2, 1, 3)
    v4 = xv.transpose(0, 2, 1, 3)
    # TODO(synk): read Q/K/V and write O directly in (B, S, H, Hd) layout via
    # the BlockSpecs (drops these transposes; needs head dim >= sublane tile).

    o5 = flash_attention_pallas(q5, k4, v4, tq=attn_tq, tk=attn_tk)
    o2d = o5.reshape(B, n_heads, S, head_dim).transpose(0, 2, 1, 3).reshape(B * S, q_out)
    out = linear_pallas(o2d, prepared["wo_t"]).reshape(B, S, D)
    return out  # past_kv is None (use_cache=False); dropout = identity (eval)


# ---------------------------- pure-JAX reference -----------------------------

def attention_reference(params, x, cos, sin, n_heads, n_kv_heads):
    B, S, D = x.shape
    head_dim = D // n_heads
    n_rep = n_heads // n_kv_heads

    def repeat_kv(t, r):
        if r == 1:
            return t
        b, s, hkv, hd = t.shape
        t = jnp.broadcast_to(t[:, :, :, None, :], (b, s, hkv, r, hd))
        return t.reshape(b, s, hkv * r, hd)

    xq = (x @ params["wq"].T).reshape(B, S, n_heads, head_dim)
    xk = (x @ params["wk"].T).reshape(B, S, n_kv_heads, head_dim)
    xv = (x @ params["wv"].T).reshape(B, S, n_kv_heads, head_dim)
    xq, xk = apply_rotary_emb(xq, xk, cos, sin)
    xk = repeat_kv(xk, n_rep)
    xv = repeat_kv(xv, n_rep)
    q = xq.transpose(0, 2, 1, 3)
    k = xk.transpose(0, 2, 1, 3)
    v = xv.transpose(0, 2, 1, 3)
    scores = q @ k.transpose(0, 1, 3, 2) / math.sqrt(head_dim)
    mask = jnp.triu(jnp.full((S, S), -jnp.inf, dtype=jnp.float32), k=1)
    scores = scores + mask[None, None]
    probs = jax.nn.softmax(scores.astype(jnp.float32), axis=-1)
    out = probs @ v
    out = out.transpose(0, 2, 1, 3).reshape(B, S, D)
    return out @ params["wo"].T


# --------------------------------- main ---------------------------------------

def _run_case(key, *, B, S, D, n_heads, n_kv_heads, attn_tq, attn_tk, tol):
    head_dim = D // n_heads
    k_x, k_q, k_k, k_v, k_o = jax.random.split(key, 5)

    x = jax.random.normal(k_x, (B, S, D), dtype=jnp.float32)
    params = {
        "wq": 0.02 * jax.random.normal(k_q, (n_heads * head_dim, D), jnp.float32),
        "wk": 0.02 * jax.random.normal(k_k, (n_kv_heads * head_dim, D), jnp.float32),
        "wv": 0.02 * jax.random.normal(k_v, (n_kv_heads * head_dim, D), jnp.float32),
        "wo": 0.02 * jax.random.normal(k_o, (D, n_heads * head_dim), jnp.float32),
    }
    cos, sin = precompute_pos_cis(head_dim, S)
    prepared = prepare_attention_params(params)   # parameter-load-time fusion

    out = attention_forward(prepared, x, cos, sin, n_heads, n_kv_heads,
                            attn_tq=attn_tq, attn_tk=attn_tk)
    out = jax.block_until_ready(out)

    with jax.default_matmul_precision("highest"):
        ref = attention_reference(params, x, cos, sin, n_heads, n_kv_heads)
    assert out.shape == (B, S, D)
    assert jnp.allclose(out, ref, atol=tol, rtol=tol), \
        f"mismatch vs reference (B={B}, S={S}, D={D})"


if __name__ == "__main__":
    key = jax.random.PRNGKey(0)
    k_small, k_med = jax.random.split(key)

    # Small shape consistent with the module (single-tile fallback path).
    _run_case(k_small, B=2, S=8, D=32, n_heads=4, n_kv_heads=2,
              attn_tq=8, attn_tk=8, tol=1e-5)

    # Medium shape exercising the multi-tile causal paths: interior (unmasked)
    # tiles, diagonal (masked) tiles, clamped/skipped tiles, and fully-masked
    # rows (tq > tk). Slightly looser tolerance for the larger contractions.
    _run_case(k_med, B=2, S=256, D=256, n_heads=4, n_kv_heads=2,
              attn_tq=128, attn_tk=64, tol=1e-4)

    print("KERNEL_OK")
</pallas_src>

<mosaic_0001>
module attributes {stable_mosaic.version = 11 : i64} {
  func.func @_matmul_kernel(%arg0: i32, %arg1: i32, %arg2: i32, %arg3: memref<16x32xf32, #tpu.memory_space<vmem>>, %arg4: memref<32x64xf32, #tpu.memory_space<vmem>>, %arg5: memref<16x64xf32, #tpu.memory_space<vmem>>, %arg6: memref<16x64xf32, #tpu.memory_space<vmem>>) attributes {dimension_semantics = [#tpu.dimension_semantics<parallel>, #tpu.dimension_semantics<parallel>, #tpu.dimension_semantics<arbitrary>], iteration_bounds = array<i64: 1, 1, 1>, scalar_prefetch = 0 : i64, scratch_operands = 1 : i64, tpu.core_type = #tpu.core_type<tc>, window_params = [{transform_indices = @transform_0, window_bounds = array<i64: 16, 32>}, {transform_indices = @transform_1, window_bounds = array<i64: 32, 64>}, {transform_indices = @transform_2, window_bounds = array<i64: 16, 64>}]} {
    %c0_i32 = arith.constant 0 : i32
    %0 = arith.cmpi eq, %arg2, %c0_i32 : i32
    %1 = arith.extui %0 : i1 to i32
    %c0_i32_0 = arith.constant 0 : i32
    %2 = arith.cmpi ne, %1, %c0_i32_0 : i32
    scf.if %2 {
      %cst_10 = arith.constant 0.000000e+00 : f32
      %12 = vector.broadcast %cst_10 : f32 to vector<16x64xf32>
      %c0_11 = arith.constant 0 : index
      %c0_12 = arith.constant 0 : index
      %13 = vector.load %arg6[%c0_11, %c0_12] : memref<16x64xf32, #tpu.memory_space<vmem>>, vector<16x64xf32>
      tpu.vector_store %arg6[%c0_11, %c0_12], %12 {strides = array<i32>} : memref<16x64xf32, #tpu.memory_space<vmem>>, vector<16x64xf32>,
    } else {
    }
    %c0 = arith.constant 0 : index
    %c0_1 = arith.constant 0 : index
    %3 = vector.load %arg6[%c0, %c0_1] : memref<16x64xf32, #tpu.memory_space<vmem>>, vector<16x64xf32>
    %c0_2 = arith.constant 0 : index
    %c0_3 = arith.constant 0 : index
    %4 = vector.load %arg3[%c0_2, %c0_3] : memref<16x32xf32, #tpu.memory_space<vmem>>, vector<16x32xf32>
    %c0_4 = arith.constant 0 : index
    %c0_5 = arith.constant 0 : index
    %5 = vector.load %arg4[%c0_4, %c0_5] : memref<32x64xf32, #tpu.memory_space<vmem>>, vector<32x64xf32>
    %cst = arith.constant dense<0.000000e+00> : vector<16x64xf32>
    %6 = tpu.matmul %4, %5, %cst {dimension_numbers = #tpu.dot_dimension_numbers<[1], [0], [0], [1], [0, 0, 1, 1], [], []>} : vector<16x32xf32>, vector<32x64xf32>, vector<16x64xf32> -> vector<16x64xf32>
    %7 = arith.addf %3, %6 : vector<16x64xf32>
    %c0_6 = arith.constant 0 : index
    %c0_7 = arith.constant 0 : index
    %8 = vector.load %arg6[%c0_6, %c0_7] : memref<16x64xf32, #tpu.memory_space<vmem>>, vector<16x64xf32>
    tpu.vector_store %arg6[%c0_6, %c0_7], %7 {strides = array<i32>} : memref<16x64xf32, #tpu.memory_space<vmem>>, vector<16x64xf32>,
    %c0_i32_8 = arith.constant 0 : i32
    %9 = arith.cmpi eq, %arg2, %c0_i32_8 : i32
    %10 = arith.extui %9 : i1 to i32
    %c0_i32_9 = arith.constant 0 : i32
    %11 = arith.cmpi ne, %10, %c0_i32_9 : i32
    scf.if %11 {
      %c0_10 = arith.constant 0 : index
      %c0_11 = arith.constant 0 : index
      %12 = vector.load %arg6[%c0_10, %c0_11] : memref<16x64xf32, #tpu.memory_space<vmem>>, vector<16x64xf32>
      %c0_12 = arith.constant 0 : index
      %c0_13 = arith.constant 0 : index
      %13 = vector.load %arg5[%c0_12, %c0_13] : memref<16x64xf32, #tpu.memory_space<vmem>>, vector<16x64xf32>
      tpu.vector_store %arg5[%c0_12, %c0_13], %12 {strides = array<i32>} : memref<16x64xf32, #tpu.memory_space<vmem>>, vector<16x64xf32>,
    } else {
    }
    return
  }
  func.func @transform_0(%arg0: i32, %arg1: i32, %arg2: i32) -> (i32, i32) {
    %c0_i32 = arith.constant 0 : i32
    return %arg0, %arg2 : i32, i32
  }
  func.func @transform_1(%arg0: i32, %arg1: i32, %arg2: i32) -> (i32, i32) {
    %c0_i32 = arith.constant 0 : i32
    return %arg2, %arg1 : i32, i32
  }
  func.func @transform_2(%arg0: i32, %arg1: i32, %arg2: i32) -> (i32, i32) {
    %c0_i32 = arith.constant 0 : i32
    return %arg0, %arg1 : i32, i32
  }
}

</mosaic_0001>

<bundles_post_ra>
// kernel: tpu_custom_call.1
= control target key start
LH: loop header
LB: loop body
LE: loop exit
PB: predicated region body
PF: predicated region fallthrough
CT: control target
= control target key end

     0   :  { %7 = vsyncpa [#allocation4], 0  ;;  %s256_s0 = inlined_call_operand.hbm [shape: f32[16,32], index: 0, kind: input, shape index: {}]   ;;  %s257_s1 = inlined_call_operand.hbm [shape: f32[32,64], index: 1, kind: input, shape index: {}]   ;;  %s258_s2 = inlined_call_operand.hbm [shape: f32[16,64], index: 2, kind: output, shape index: {}]  }
   0x1   :  { %8 = vsyncpa [#allocation7], 0 }
   0x2   :  { %9 = vsyncpa [#allocation5], 0  ;;  %s14_s11 = sshll.u32 %s256_s0, 4  ;;  %s211_s12 = smov [#allocation3]   ;;  %s15_s11 = int_to_ptr.hbm [resolvable:$true] %s14_s11 }
   0x3   :  { %s16_s13 = sshll.u32 %s211_s12, 4  ;;  %s27_s16 = sshll.u32 %s257_s1, 4  ;;  %s17_s13 = int_to_ptr.vmem [resolvable:$true] %s16_s13  ;;  %s28_s16 = int_to_ptr.hbm [resolvable:$true] %s27_s16 }
   0x4   :  { %s212_s17 = smov 128   ;;  %s213_s18 = smov 8  }
   0x5   :  { %22 = dma.hbm_to_vmem [thread:$0]  %s15_s11, 256, %s17_s13, [#allocation4], %s212_s17, %s212_s17, %s213_s18  }
   0x6   :  { %s214_s19 = smov [#allocation6]  }
   0x7   :  { %s29_s20 = sshll.u32 %s214_s19, 4  ;;  %s30_s20 = int_to_ptr.vmem [resolvable:$true] %s29_s20 }
   0x8   :  { %35 = dma.hbm_to_vmem [thread:$0]  %s28_s16, 512, %s30_s20, [#allocation7], %s212_s17, %s212_s17, %s213_s18  }
   0x9   :  { %205 = dma.done.wait [#allocation4], 256  }
   0xa   :  { %206 = vsyncadd [#allocation4], 4294967040 }
   0xb   :  { %207 = dma.done.wait [#allocation7], 512  }
   0xc   :  { %208 = vsyncadd [#allocation7], 4294966784  ;;  %vm48_vm0 = vcmask 523264   ;;  %v215_v0 = vmov 0.0   ;;  %v58_v1 = vld [vmem:[#allocation6 + $0x18] sm:$0xff]  ;;  %v57_v2 = vld [vmem:[#allocation6 + $0x10] sm:$0xff] }
   0xd   :  { %49 = vst.msk [vmem:[#allocation2] sm:$0xff] %vm48_vm0, %v215_v0  ;;  %78 = vmatpush.msra.mxu0 %v58_v1  ;;  %123 = vmatpush.msra.mxu1 %v58_v1  ;;  %v56_v3 = vld [vmem:[#allocation6 + $0x8] sm:$0xff]  ;;  %v55_v4 = vld [vmem:[#allocation6] sm:$0xff]  ;;  %v53_v5 = vld [vmem:[#allocation3] sm:$0xff]  ;;  %vm59_vm1 = vcmask 261120   ;;  %s216_s0 = smov [#allocation8]  }
   0xe   :  { %50 = vst.msk [vmem:[#allocation2 + $0x8] sm:$0xff] %vm48_vm0, %v215_v0  ;;  %v54_v6 = vld [vmem:[#allocation3 + $0x8] sm:$0xff]  ;;  %s105_s1 = sshll.u32 %s216_s0, 4  ;;  %s107_s23 = sshll.u32 %s258_s2, 4  ;;  %s106_s1 = int_to_ptr.vmem [resolvable:$true] %s105_s1  ;;  %s108_s23 = int_to_ptr.hbm [resolvable:$true] %s107_s23 }
   0xf   :  { %79 = vmatpush.msra.mxu0 %v57_v2  ;;  %124 = vmatpush.msra.mxu1 %v57_v2 }
  0x11   :  { %80 = vmatpush.msra.mxu0 %v56_v3  ;;  %125 = vmatpush.msra.mxu1 %v56_v3 }
  0x13   :  { %81 = vmatpush.msra.mxu0 %v55_v4  ;;  %126 = vmatpush.msra.mxu1 %v55_v4 }
  0x14   :  { %121 = vmatmul.msk.f32.vlgmr.msra.gmra.mxu0 %vm59_vm1, %v53_v5  ;;  %122 = vmatmul.msk.f32.vlgmr.msra.gmra.mxu1 %vm59_vm1, %v54_v6  ;;  %v51_v7 = vld [vmem:[#allocation2] sm:$0xff] }
  0x15   :  { %v52_v8 = vld [vmem:[#allocation2 + $0x8] sm:$0xff] }
  0x91   :  { %v83_v9 = vpop.f32.mrf.mxu0  ;;  %v86_v10 = vpop.f32.mrf.mxu1 }
  0x92   :  { %v89_v11 = vadd.f32 %v83_v9, %v51_v7  ;;  %v90_v12 = vadd.f32 %v86_v10, %v52_v8 }
  0x94   :  { %92 = vst.msk [vmem:[#allocation2] sm:$0xff] %vm48_vm0, %v89_v11 }
  0x95   :  { %93 = vst.msk [vmem:[#allocation2 + $0x8] sm:$0xff] %vm48_vm0, %v90_v12 }
  0x9b   :  { %v97_v13 = vld [vmem:[#allocation2] sm:$0xff] }
  0x9c   :  { %v98_v14 = vld [vmem:[#allocation2 + $0x8] sm:$0xff]  ;;  %99 = vst.msk [vmem:[#allocation8] sm:$0xff] %vm48_vm0, %v97_v13 }
  0x9d   :  { %100 = vst.msk [vmem:[#allocation8 + $0x8] sm:$0xff] %vm48_vm0, %v98_v14 }
  0x9e   :  { %113 = dma.vmem_to_hbm [thread:$0]  %s106_s1, 256, %s108_s23, [#allocation5], %s212_s17, %s212_s17, %s213_s18  }
  0x9f   :  { %209 = dma.done.wait [#allocation5], 256  }
  0xa0   :  { %210 = vsyncadd [#allocation5], 4294967040 }
  0xa1   :  { %118 = vsyncpa [#allocation4], 1 }
  0xa2   :  { %119 = vsyncpa [#allocation7], 1 }
  0xa3   :  { %120 = vsyncpa [#allocation5], 1 }

</bundles_post_ra>
